<compile_context>
chip_gen: v7x
topology: tpu7x:2x2x1
jax: 0.10.0
libtpu: 0.0.40
codegen_flags: <defaults>
</compile_context>

<pallas_src>
import jax
import jax.numpy as jnp
from jax.experimental import pallas as pl
from jax.experimental.pallas import tpu as pltpu


IN_DIM = 42
H1, H2, H3 = 256, 128, 64
OUT_DIM = 5

K_PAD = 64          # 42 features + 1 bias column + zero pad -> aligned K
BIAS_COL = IN_DIM   # padded-x column carrying the constant 1.0 (fc1 bias fold)
OUT_PAD = 128       # 5 -> 128 so the final store is lane-dense


def _round_up(x, m):
    return (x + m - 1) // m * m


def _choose_tm(batch, tm_cap=1024):
    """Batch-tile size: multiple of 16 (bf16 sublane packing). Small batches get
    one right-sized tile; large batches use up to `tm_cap` rows/step but keep
    >= 2 grid steps so v7x's two TensorCores both get work."""
    bp = _round_up(max(batch, 16), 16)
    if bp <= 256:
        return bp
    return min(tm_cap, _round_up(pl.cdiv(bp, 2), 16))


def mlp_kernel(x_ref,
               w1_ref,
               w2_ref, b2_ref,
               w3_ref, b3_ref,
               w4_ref, b4_ref,
               o_ref):
    # x tile: (TM, K_PAD) bf16 with column BIAS_COL == 1.0; weights bf16;
    # biases f32; output bf16.
    x = x_ref[...]

    # fc1: bias folded into row BIAS_COL of w1 (no explicit add needed).
    h1 = jnp.dot(x, w1_ref[...], preferred_element_type=jnp.float32)
    h1 = jnp.maximum(h1, 0.0).astype(jnp.bfloat16)

    h2 = jnp.dot(h1, w2_ref[...], preferred_element_type=jnp.float32) + b2_ref[...]
    h2 = jnp.maximum(h2, 0.0).astype(jnp.bfloat16)

    h3 = jnp.dot(h2, w3_ref[...], preferred_element_type=jnp.float32) + b3_ref[...]
    h3 = jnp.maximum(h3, 0.0).astype(jnp.bfloat16)

    h4 = jnp.dot(h3, w4_ref[...], preferred_element_type=jnp.float32) + b4_ref[...]

    o_ref[...] = h4.astype(o_ref.dtype)   # bf16 lane-dense store


@jax.jit
def mlp_forward(x, prepared):
    """x: (B, 42) float32. prepared: padded bf16 weights / f32 biases."""
    B = x.shape[0]
    tm = _choose_tm(B)
    Bp = _round_up(B, tm)

    # Pad batch + feature dim, plant the fc1-bias column, cast to bf16 — all
    # inside this jit so it fuses (no standalone HBM pass over x).
    x_pad = jnp.zeros((Bp, K_PAD), jnp.bfloat16)
    x_pad = x_pad.at[:B, :IN_DIM].set(x.astype(jnp.bfloat16))
    x_pad = x_pad.at[:B, BIAS_COL].set(jnp.bfloat16(1.0))

    operands = (x_pad,
                prepared["w1"],
                prepared["w2"], prepared["b2"],
                prepared["w3"], prepared["b3"],
                prepared["w4"], prepared["b4"])

    # Weights/biases: whole-array blocks with a constant index_map
    # -> loaded once, VMEM-resident across the batch loop.
    def resident(arr):
        nd = arr.ndim
        return pl.BlockSpec(arr.shape, lambda i, _nd=nd: (0,) * _nd)

    in_specs = [pl.BlockSpec((tm, K_PAD), lambda i: (i, 0))]
    in_specs += [resident(a) for a in operands[1:]]

    flops = 2 * Bp * (K_PAD * H1 + H1 * H2 + H2 * H3 + H3 * OUT_PAD)
    bytes_accessed = (
        x_pad.size * x_pad.dtype.itemsize
        + Bp * OUT_PAD * 2   # bf16 output
        + sum(int(a.size) * a.dtype.itemsize for a in operands[1:])
    )

    out_padded = pl.pallas_call(
        mlp_kernel,
        out_shape=jax.ShapeDtypeStruct((Bp, OUT_PAD), jnp.bfloat16),
        grid=(Bp // tm,),
        in_specs=in_specs,
        out_specs=pl.BlockSpec((tm, OUT_PAD), lambda i: (i, 0)),
        compiler_params=pltpu.CompilerParams(
            dimension_semantics=("parallel",),   # batch axis splits across v7x's 2 TCs
            vmem_limit_bytes=16 << 20,
        ),
        cost_estimate=pl.CostEstimate(
            flops=flops, transcendentals=0, bytes_accessed=bytes_accessed),
    )(*operands)

    # Slice stays inside the same jit so it fuses with any downstream consumer
    # (e.g. argmax). Padded logit columns >= 5 are exactly 0.0 by construction.
    return out_padded[:B, :OUT_DIM].astype(jnp.float32)


def init_params(key):
    """Deterministic f32 init mimicking PyTorch nn.Linear defaults
    (uniform in [-1/sqrt(fan_in), 1/sqrt(fan_in)]); weights stored (in, out)."""
    dims = [(IN_DIM, H1), (H1, H2), (H2, H3), (H3, OUT_DIM)]
    params = {}
    for idx, (fan_in, fan_out) in enumerate(dims, start=1):
        key, kw, kb = jax.random.split(key, 3)
        bound = 1.0 / jnp.sqrt(fan_in)
        params[f"w{idx}"] = jax.random.uniform(
            kw, (fan_in, fan_out), jnp.float32, -bound, bound)
        params[f"b{idx}"] = jax.random.uniform(
            kb, (1, fan_out), jnp.float32, -bound, bound)
    return params


def prepare_params(params):
    """One-time host-side prep: pad fc1's K (42->64) and fold b1 into row
    BIAS_COL of w1; pad fc4's N (5->128); cast weights to bf16 (MXU operands);
    keep the remaining biases f32 (VPU adds)."""
    w1 = jnp.zeros((K_PAD, H1), jnp.float32)
    w1 = w1.at[:IN_DIM].set(params["w1"])
    w1 = w1.at[BIAS_COL].set(params["b1"][0])          # fc1 bias fold
    w4 = jnp.zeros((H3, OUT_PAD), jnp.float32).at[:, :OUT_DIM].set(params["w4"])
    b4 = jnp.zeros((1, OUT_PAD), jnp.float32).at[:, :OUT_DIM].set(params["b4"])
    return {
        "w1": w1.astype(jnp.bfloat16),
        "w2": params["w2"].astype(jnp.bfloat16), "b2": params["b2"],
        "w3": params["w3"].astype(jnp.bfloat16), "b3": params["b3"],
        "w4": w4.astype(jnp.bfloat16), "b4": b4,
    }


def reference_forward(x, prepared):
    """Pure-JAX reference following the same bf16-operand / f32-accumulate /
    bias-folded path as the kernel."""
    B = x.shape[0]
    h = jnp.zeros((B, K_PAD), jnp.bfloat16)
    h = h.at[:, :IN_DIM].set(x.astype(jnp.bfloat16))
    h = h.at[:, BIAS_COL].set(jnp.bfloat16(1.0))
    h = jnp.maximum(
        jnp.dot(h, prepared["w1"], preferred_element_type=jnp.float32), 0.0
    ).astype(jnp.bfloat16)
    h = jnp.maximum(
        jnp.dot(h, prepared["w2"], preferred_element_type=jnp.float32)
        + prepared["b2"], 0.0).astype(jnp.bfloat16)
    h = jnp.maximum(
        jnp.dot(h, prepared["w3"], preferred_element_type=jnp.float32)
        + prepared["b3"], 0.0).astype(jnp.bfloat16)
    out = (jnp.dot(h, prepared["w4"], preferred_element_type=jnp.float32)
           + prepared["b4"])
    return out[:, :OUT_DIM].astype(jnp.bfloat16).astype(jnp.float32)


def reference_forward_f32(x, params):
    """Full-precision reference matching the original PyTorch math."""
    h = x
    for i in range(1, 4):
        h = jnp.maximum(h @ params[f"w{i}"] + params[f"b{i}"], 0.0)
    return h @ params["w4"] + params["b4"]


if __name__ == "__main__":
    key = jax.random.PRNGKey(0)
    key, kx_small, kx_big = jax.random.split(key, 3)

    params = init_params(key)
    prepared = prepare_params(params)

    # Small batch (launch-bound path: single grid step).
    batch = 8
    x = jax.random.normal(kx_small, (batch, IN_DIM), jnp.float32)
    out = jax.block_until_ready(mlp_forward(x, prepared))
    assert out.shape == (batch, OUT_DIM), out.shape
    ref = reference_forward(x, prepared)
    assert jnp.allclose(out, ref, atol=2e-3, rtol=2e-3), "mismatch vs bf16 reference"
    ref_f32 = reference_forward_f32(x, params)
    assert jnp.allclose(out, ref_f32, atol=5e-2, rtol=5e-2), "bf16 drift too large"

    # Larger batch exercising the multi-step (>=2 tiles) grid path.
    batch_big = 600
    x_big = jax.random.normal(kx_big, (batch_big, IN_DIM), jnp.float32)
    out_big = jax.block_until_ready(mlp_forward(x_big, prepared))
    assert out_big.shape == (batch_big, OUT_DIM), out_big.shape
    ref_big = reference_forward(x_big, prepared)
    assert jnp.allclose(out_big, ref_big, atol=2e-3, rtol=2e-3), "mismatch (big batch)"

    # NOTE: the module's `SoftMax` method is a Python-side argmax -> string
    # lookup (host post-processing), not part of forward(); intentionally not
    # a kernel.
    print("KERNEL_OK")
</pallas_src>

<mosaic_0001>
module attributes {stable_mosaic.version = 11 : i64} {
  func.func @mlp_kernel(%arg0: i32, %arg1: memref<16x64xbf16, #tpu.memory_space<vmem>>, %arg2: memref<64x256xbf16, #tpu.memory_space<vmem>>, %arg3: memref<256x128xbf16, #tpu.memory_space<vmem>>, %arg4: memref<1x128xf32, #tpu.memory_space<vmem>>, %arg5: memref<128x64xbf16, #tpu.memory_space<vmem>>, %arg6: memref<1x64xf32, #tpu.memory_space<vmem>>, %arg7: memref<64x128xbf16, #tpu.memory_space<vmem>>, %arg8: memref<1x128xf32, #tpu.memory_space<vmem>>, %arg9: memref<16x128xbf16, #tpu.memory_space<vmem>>) attributes {dimension_semantics = [#tpu.dimension_semantics<parallel>], iteration_bounds = array<i64: 1>, scalar_prefetch = 0 : i64, scratch_operands = 0 : i64, tpu.core_type = #tpu.core_type<tc>, window_params = [{transform_indices = @transform_0, window_bounds = array<i64: 16, 64>}, {pipeline_mode = #tpu.pipeline_mode<synchronous>, transform_indices = @transform_1, window_bounds = array<i64: 64, 256>}, {pipeline_mode = #tpu.pipeline_mode<synchronous>, transform_indices = @transform_2, window_bounds = array<i64: 256, 128>}, {pipeline_mode = #tpu.pipeline_mode<synchronous>, transform_indices = @transform_3, window_bounds = array<i64: 1, 128>}, {pipeline_mode = #tpu.pipeline_mode<synchronous>, transform_indices = @transform_4, window_bounds = array<i64: 128, 64>}, {pipeline_mode = #tpu.pipeline_mode<synchronous>, transform_indices = @transform_5, window_bounds = array<i64: 1, 64>}, {pipeline_mode = #tpu.pipeline_mode<synchronous>, transform_indices = @transform_6, window_bounds = array<i64: 64, 128>}, {pipeline_mode = #tpu.pipeline_mode<synchronous>, transform_indices = @transform_7, window_bounds = array<i64: 1, 128>}, {transform_indices = @transform_8, window_bounds = array<i64: 16, 128>}]} {
    %c0 = arith.constant 0 : index
    %c0_0 = arith.constant 0 : index
    %0 = vector.load %arg1[%c0, %c0_0] : memref<16x64xbf16, #tpu.memory_space<vmem>>, vector<16x64xbf16>
    %c0_1 = arith.constant 0 : index
    %c0_2 = arith.constant 0 : index
    %1 = vector.load %arg2[%c0_1, %c0_2] : memref<64x256xbf16, #tpu.memory_space<vmem>>, vector<64x256xbf16>
    %cst = arith.constant dense<0.000000e+00> : vector<16x256xf32>
    %2 = tpu.matmul %0, %1, %cst {dimension_numbers = #tpu.dot_dimension_numbers<[1], [0], [0], [1], [0, 0, 1, 1], [], []>} : vector<16x64xbf16>, vector<64x256xbf16>, vector<16x256xf32> -> vector<16x256xf32>
    %cst_3 = arith.constant 0.000000e+00 : f32
    %3 = vector.broadcast %cst_3 : f32 to vector<16x256xf32>
    %4 = arith.maximumf %2, %3 : vector<16x256xf32>
    %5 = arith.truncf %4 : vector<16x256xf32> to vector<16x256xbf16>
    %c0_4 = arith.constant 0 : index
    %c0_5 = arith.constant 0 : index
    %6 = vector.load %arg3[%c0_4, %c0_5] : memref<256x128xbf16, #tpu.memory_space<vmem>>, vector<256x128xbf16>
    %cst_6 = arith.constant dense<0.000000e+00> : vector<16x128xf32>
    %7 = tpu.matmul %5, %6, %cst_6 {dimension_numbers = #tpu.dot_dimension_numbers<[1], [0], [0], [1], [0, 0, 1, 1], [], []>} : vector<16x256xbf16>, vector<256x128xbf16>, vector<16x128xf32> -> vector<16x128xf32>
    %c0_7 = arith.constant 0 : index
    %c0_8 = arith.constant 0 : index
    %8 = vector.load %arg4[%c0_7, %c0_8] : memref<1x128xf32, #tpu.memory_space<vmem>>, vector<1x128xf32>
    %9 = vector.broadcast %8 : vector<1x128xf32> to vector<16x128xf32>
    %10 = arith.addf %7, %9 : vector<16x128xf32>
    %cst_9 = arith.constant 0.000000e+00 : f32
    %11 = vector.broadcast %cst_9 : f32 to vector<16x128xf32>
    %12 = arith.maximumf %10, %11 : vector<16x128xf32>
    %13 = arith.truncf %12 : vector<16x128xf32> to vector<16x128xbf16>
    %c0_10 = arith.constant 0 : index
    %c0_11 = arith.constant 0 : index
    %14 = vector.load %arg5[%c0_10, %c0_11] : memref<128x64xbf16, #tpu.memory_space<vmem>>, vector<128x64xbf16>
    %cst_12 = arith.constant dense<0.000000e+00> : vector<16x64xf32>
    %15 = tpu.matmul %13, %14, %cst_12 {dimension_numbers = #tpu.dot_dimension_numbers<[1], [0], [0], [1], [0, 0, 1, 1], [], []>} : vector<16x128xbf16>, vector<128x64xbf16>, vector<16x64xf32> -> vector<16x64xf32>
    %c0_13 = arith.constant 0 : index
    %c0_14 = arith.constant 0 : index
    %16 = vector.load %arg6[%c0_13, %c0_14] : memref<1x64xf32, #tpu.memory_space<vmem>>, vector<1x64xf32>
    %17 = vector.broadcast %16 : vector<1x64xf32> to vector<16x64xf32>
    %18 = arith.addf %15, %17 : vector<16x64xf32>
    %cst_15 = arith.constant 0.000000e+00 : f32
    %19 = vector.broadcast %cst_15 : f32 to vector<16x64xf32>
    %20 = arith.maximumf %18, %19 : vector<16x64xf32>
    %21 = arith.truncf %20 : vector<16x64xf32> to vector<16x64xbf16>
    %c0_16 = arith.constant 0 : index
    %c0_17 = arith.constant 0 : index
    %22 = vector.load %arg7[%c0_16, %c0_17] : memref<64x128xbf16, #tpu.memory_space<vmem>>, vector<64x128xbf16>
    %cst_18 = arith.constant dense<0.000000e+00> : vector<16x128xf32>
    %23 = tpu.matmul %21, %22, %cst_18 {dimension_numbers = #tpu.dot_dimension_numbers<[1], [0], [0], [1], [0, 0, 1, 1], [], []>} : vector<16x64xbf16>, vector<64x128xbf16>, vector<16x128xf32> -> vector<16x128xf32>
    %c0_19 = arith.constant 0 : index
    %c0_20 = arith.constant 0 : index
    %24 = vector.load %arg8[%c0_19, %c0_20] : memref<1x128xf32, #tpu.memory_space<vmem>>, vector<1x128xf32>
    %25 = vector.broadcast %24 : vector<1x128xf32> to vector<16x128xf32>
    %26 = arith.addf %23, %25 : vector<16x128xf32>
    %27 = arith.truncf %26 : vector<16x128xf32> to vector<16x128xbf16>
    %c0_21 = arith.constant 0 : index
    %c0_22 = arith.constant 0 : index
    %28 = vector.load %arg9[%c0_21, %c0_22] : memref<16x128xbf16, #tpu.memory_space<vmem>>, vector<16x128xbf16>
    tpu.vector_store %arg9[%c0_21, %c0_22], %27 {strides = array<i32>} : memref<16x128xbf16, #tpu.memory_space<vmem>>, vector<16x128xbf16>,
    return
  }
  func.func @transform_0(%arg0: i32) -> (i32, i32) {
    %c0_i32 = arith.constant 0 : i32
    %c0_i32_0 = arith.constant 0 : i32
    return %arg0, %c0_i32 : i32, i32
  }
  func.func @transform_1(%arg0: i32) -> (i32, i32) {
    %c0_i32 = arith.constant 0 : i32
    %c0_i32_0 = arith.constant 0 : i32
    %c0_i32_1 = arith.constant 0 : i32
    return %c0_i32, %c0_i32_0 : i32, i32
  }
  func.func @transform_2(%arg0: i32) -> (i32, i32) {
    %c0_i32 = arith.constant 0 : i32
    %c0_i32_0 = arith.constant 0 : i32
    %c0_i32_1 = arith.constant 0 : i32
    return %c0_i32, %c0_i32_0 : i32, i32
  }
  func.func @transform_3(%arg0: i32) -> (i32, i32) {
    %c0_i32 = arith.constant 0 : i32
    %c0_i32_0 = arith.constant 0 : i32
    %c0_i32_1 = arith.constant 0 : i32
    return %c0_i32, %c0_i32_0 : i32, i32
  }
  func.func @transform_4(%arg0: i32) -> (i32, i32) {
    %c0_i32 = arith.constant 0 : i32
    %c0_i32_0 = arith.constant 0 : i32
    %c0_i32_1 = arith.constant 0 : i32
    return %c0_i32, %c0_i32_0 : i32, i32
  }
  func.func @transform_5(%arg0: i32) -> (i32, i32) {
    %c0_i32 = arith.constant 0 : i32
    %c0_i32_0 = arith.constant 0 : i32
    %c0_i32_1 = arith.constant 0 : i32
    return %c0_i32, %c0_i32_0 : i32, i32
  }
  func.func @transform_6(%arg0: i32) -> (i32, i32) {
    %c0_i32 = arith.constant 0 : i32
    %c0_i32_0 = arith.constant 0 : i32
    %c0_i32_1 = arith.constant 0 : i32
    return %c0_i32, %c0_i32_0 : i32, i32
  }
  func.func @transform_7(%arg0: i32) -> (i32, i32) {
    %c0_i32 = arith.constant 0 : i32
    %c0_i32_0 = arith.constant 0 : i32
    %c0_i32_1 = arith.constant 0 : i32
    return %c0_i32, %c0_i32_0 : i32, i32
  }
  func.func @transform_8(%arg0: i32) -> (i32, i32) {
    %c0_i32 = arith.constant 0 : i32
    %c0_i32_0 = arith.constant 0 : i32
    return %arg0, %c0_i32 : i32, i32
  }
}

</mosaic_0001>

<bundles_post_ra>
// kernel: mlp_forward.1
= control target key start
LH: loop header
LB: loop body
LE: loop exit
PB: predicated region body
PF: predicated region fallthrough
CT: control target
= control target key end

     0   :  { %13 = vsyncpa [#allocation3], 0  ;;  %s734_s27 = smov [#allocation2]   ;;  %s898_s0 = inlined_call_operand.vmem [shape: bf16[16,64], index: 0, kind: input, shape index: {}]   ;;  %s899_s1 = inlined_call_operand.hbm [shape: bf16[64,256], index: 1, kind: input, shape index: {}]   ;;  %s900_s2 = inlined_call_operand.vmem [shape: bf16[256,128], index: 2, kind: input, shape index: {}]   ;;  %s901_s3 = inlined_call_operand.vmem [shape: f32[1,128], index: 3, kind: input, shape index: {}]   ;;  %s902_s4 = inlined_call_operand.vmem [shape: bf16[128,64], index: 4, kind: input, shape index: {}]   ;;  %s903_s5 = inlined_call_operand.vmem [shape: f32[1,64], index: 5, kind: input, shape index: {}]   ;;  %s904_s6 = inlined_call_operand.vmem [shape: bf16[64,128], index: 6, kind: input, shape index: {}]   ;;  %s905_s7 = inlined_call_operand.vmem [shape: f32[1,128], index: 7, kind: input, shape index: {}]   ;;  %s906_s8 = inlined_call_operand.vmem [shape: bf16[16,128], index: 8, kind: output, shape index: {}]  }
   0x1   :  { %s21_s28 = sshll.u32 %s734_s27, 4  ;;  %s710_s9 = scalar_lea.hbm %s899_s1, 1024  ;;  %s22_s28 = int_to_ptr.vmem [resolvable:$true] %s21_s28 }
   0x2   :  { %p711_p0 = scmp.ne.s32.totalorder %s899_s1, %s710_s9  ;;  %p714_p1 = scmp.lt.u32.totalorder %s710_s9, %s899_s1 }
   0x4   :  { %p716_p2 = pnand %p714_p1, %p711_p0 }
   0x6   :  { %719 = shalt.err (!%p716_p2)
}
   0x7   :  { %s720_s14 = scalar_lea.vmem %s22_s28, 1024  ;;  %p725_p4 = scmp.lt.s32.totalorder %s22_s28, %s22_s28 }
   0x8   :  { %p721_p3 = scmp.ne.s32.totalorder %s22_s28, %s720_s14  ;;  %p726_p5 = scmp.lt.s32.totalorder %s720_s14, %s720_s14 }
   0xa   :  { %p727_p6 = por %p726_p5, %p725_p4 }
   0xc   :  { %p728_p7 = pnand %p727_p6, %p721_p3 }
   0xe   :  { %731 = shalt.err (!%p728_p7)
}
   0xf   :  { %s735_s15 = smov 128   ;;  %s736_s16 = smov 8  }
  0x10   :  { %27 = dma.hbm_to_vmem [thread:$0]  %s899_s1, 1024, %s22_s28, [#allocation3], %s735_s15, %s735_s15, %s736_s16  }
  0x11   :  { %732 = dma.done.wait [#allocation3], 1024  }
  0x12   :  { %733 = vsyncadd [#allocation3], 4294966272  ;;  %v737_v0 = vmov 0   ;;  %v669_v1 = vld [vmem:[#allocation2 + $0x4] ss:$8 sps:$4 sm:$0xff]   ;;  %v686_v13 = vld [vmem:[%s900_s2 + $0x50] sm:$0xff]  }
  0x13   :  { %135 = vmatprep.mubr.bf16.mxu0 %v737_v0  ;;  %v671_v2 = vld [vmem:[#allocation2] ss:$8 sps:$4 sm:$0xff]   ;;  %103 = vmatprep.subr.bf16.mxu0 %v669_v1  ;;  %v672_v3 = vld [vmem:[#allocation2 + $0x14] ss:$8 sps:$4 sm:$0xff]   ;;  %v674_v4 = vld [vmem:[#allocation2 + $0x10] ss:$8 sps:$4 sm:$0xff]  }
  0x14   :  { %104 = vmatpush1.bf16.msra.mxu0 %v671_v2  ;;  %v675_v5 = vld [vmem:[#allocation2 + $0x24] ss:$8 sps:$4 sm:$0xff]   ;;  %v677_v6 = vld [vmem:[#allocation2 + $0x20] ss:$8 sps:$4 sm:$0xff]   ;;  %v678_v7 = vld [vmem:[#allocation2 + $0x34] ss:$8 sps:$4 sm:$0xff]  }
  0x15   :  { %105 = vmatprep.subr.bf16.mxu0 %v672_v3  ;;  %v682_v8 = vld [vmem:[%s900_s2 + $0x40] sm:$0xff]   ;;  %v680_v10 = vld [vmem:[#allocation2 + $0x30] ss:$8 sps:$4 sm:$0xff]   ;;  %v684_v11 = vld [vmem:[%s900_s2 + $0x48] sm:$0xff]   ;;  %vm99_vm0 = vcmask 523264   ;;  %v738_v27 = vmov 0.0  }
  0x16   :  { %v683_v9 = vld [vmem:[%s900_s2] sm:$0xff]   ;;  %595 = vmatprep.subr.bf16.mxu1 %v682_v8  ;;  %v685_v12 = vld [vmem:[%s900_s2 + $0x8] sm:$0xff]   ;;  %v687_v15 = vld [vmem:[%s900_s2 + $0x10] sm:$0xff]   ;;  %vm739_vm1 = vmmov 0  }
  0x17   :  { %596 = vmatpush3.bf16.msra.mxu1 %v683_v9  ;;  %v681_v14 = vld [vmem:[%s898_s0] sm:$0xff]   ;;  %v688_v16 = vld [vmem:[%s900_s2 + $0x58] sm:$0xff]   ;;  %v692_v20 = vld [vmem:[%s900_s2 + $0x68] sm:$0xff]  }
  0x18   :  { %106 = vmatpush1.bf16.msra.mxu0 %v674_v4  ;;  %597 = vmatprep.subr.bf16.mxu1 %v684_v11  ;;  %v689_v17 = vld [vmem:[%s900_s2 + $0x18] sm:$0xff]   ;;  %v690_v18 = vld [vmem:[%s900_s2 + $0x60] sm:$0xff]   ;;  %v693_v21 = vld [vmem:[%s900_s2 + $0x28] sm:$0xff]  }
  0x19   :  { %107 = vmatprep.subr.bf16.mxu0 %v675_v5  ;;  %v691_v19 = vld [vmem:[%s900_s2 + $0x20] sm:$0xff]   ;;  %v694_v22 = vld [vmem:[%s900_s2 + $0x70] sm:$0xff]   ;;  %v696_v24 = vld [vmem:[%s900_s2 + $0x78] sm:$0xff]  }
  0x1a   :  { %v695_v23 = vld [vmem:[%s900_s2 + $0x30] sm:$0xff]   ;;  %v697_v25 = vld [vmem:[%s900_s2 + $0x38] sm:$0xff]   ;;  %v698_v26 = vld [vmem:[%s902_s4] sm:$0xff]  }
  0x1b   :  { %598 = vmatpush3.bf16.msra.mxu1 %v685_v12  ;;  %v699_v28 = vld [vmem:[%s902_s4 + $0x8] sm:$0xff]   ;;  %v700_v29 = vld [vmem:[%s902_s4 + $0x10] sm:$0xff]   ;;  %v701_v30 = vld [vmem:[%s902_s4 + $0x18] sm:$0xff]  }
  0x1c   :  { %108 = vmatpush1.bf16.msra.mxu0 %v677_v6  ;;  %599 = vmatprep.subr.bf16.mxu1 %v686_v13  ;;  %v702_v31 = vld [vmem:[%s902_s4 + $0x20] sm:$0xff]   ;;  %v703_v42 = vld [vmem:[%s902_s4 + $0x28] sm:$0xff]   ;;  %v704_v43 = vld [vmem:[%s902_s4 + $0x30] sm:$0xff]  }
  0x1d   :  { %109 = vmatprep.subr.bf16.mxu0 %v678_v7  ;;  %v705_v44 = vld [vmem:[%s902_s4 + $0x38] sm:$0xff]   ;;  %v706_v45 = vld [vmem:[%s904_s6] sm:$0xff]   ;;  %v707_v46 = vld [vmem:[%s904_s6 + $0x8] sm:$0xff]  }
  0x1e   :  { %v554_v48 = vld [vmem:[%s901_s3] ss:$0 sm:$0xff]  ;;  %v708_v59 = vld [vmem:[%s904_s6 + $0x10] sm:$0xff]   ;;  %v709_v60 = vld [vmem:[%s904_s6 + $0x18] sm:$0xff]  }
  0x1f   :  { %600 = vmatpush3.bf16.msra.mxu1 %v687_v15  ;;  %v571_v61 = vld [vmem:[%s903_s5] ss:$0 sm:$0xff] }
  0x20   :  { %110 = vmatpush1.bf16.msra.mxu0 %v680_v10  ;;  %601 = vmatprep.subr.bf16.mxu1 %v688_v16  ;;  %v580_v7 = vld [vmem:[%s905_s7] ss:$0 sm:$0xff] }
  0x21   :  { %631 = vmatprep.subr.bf16.mxu0 %v738_v27 }
  0x23   :  { %553 = vmatmul.mubr.msk.bf16.vlgmr.msra.gmra.mrb[0].mxu0 %vm99_vm0, %v681_v14  ;;  %602 = vmatpush3.bf16.msra.mxu1 %v689_v17 }
  0x24   :  { %603 = vmatprep.subr.bf16.mxu1 %v690_v18  ;;  %632 = vmatpush3.bf16.msra.mxu0 %v698_v26 }
  0x25   :  { %633 = vmatprep.subr.bf16.mxu0 %v738_v27  ;;  %647 = vmatprep.mubr.msk.bf16.mxu0 %vm739_vm1, %v738_v27 }
  0x27   :  { %604 = vmatpush3.bf16.msra.mxu1 %v691_v19 }
  0x28   :  { %605 = vmatprep.subr.bf16.mxu1 %v692_v20  ;;  %634 = vmatpush3.bf16.msra.mxu0 %v699_v28 }
  0x29   :  { %635 = vmatprep.subr.bf16.mxu0 %v738_v27 }
  0x2b   :  { %606 = vmatpush3.bf16.msra.mxu1 %v693_v21 }
  0x2c   :  { %607 = vmatprep.subr.bf16.mxu1 %v694_v22  ;;  %636 = vmatpush3.bf16.msra.mxu0 %v700_v29 }
  0x2d   :  { %637 = vmatprep.subr.bf16.mxu0 %v738_v27 }
  0x2f   :  { %608 = vmatpush3.bf16.msra.mxu1 %v695_v23 }
  0x30   :  { %609 = vmatprep.subr.bf16.mxu1 %v696_v24  ;;  %638 = vmatpush3.bf16.msra.mxu0 %v701_v30 }
  0x31   :  { %639 = vmatprep.subr.bf16.mxu0 %v738_v27 }
  0x33   :  { %610 = vmatpush3.bf16.msra.mxu1 %v697_v25 }
  0x34   :  { %651 = vmatprep.subr.bf16.mxu1 %v738_v27  ;;  %640 = vmatpush3.bf16.msra.mxu0 %v702_v31 }
  0x35   :  { %641 = vmatprep.subr.bf16.mxu0 %v738_v27 }
  0x38   :  { %642 = vmatpush3.bf16.msra.mxu0 %v703_v42 }
  0x39   :  { %643 = vmatprep.subr.bf16.mxu0 %v738_v27 }
  0x3c   :  { %644 = vmatpush3.bf16.msra.mxu0 %v704_v43 }
  0x3d   :  { %645 = vmatprep.subr.bf16.mxu0 %v738_v27 }
  0x40   :  { %646 = vmatpush3.bf16.msra.mxu0 %v705_v44 }
  0xf6   :  { %v137_v32 = vpop.f32.mrb[0].mxu0 }
  0xf7   :  { %v139_v33 = vpop.f32.mrb[1].mxu0  ;;  %v146_v35 = vmax.f32 %v137_v32, 0.0 }
  0xf8   :  { %v141_v34 = vpop.f32.mrb[2].mxu0  ;;  %v147_v38 = vmax.f32 %v139_v33, 0.0 }
  0xf9   :  { %v148_v36 = vmax.f32 %v141_v34, 0.0  ;;  %v143_v37 = vpop.f32.mrb[3].mxu0 }
  0xfa   :  { %v149_v39 = vmax.f32 %v143_v37, 0.0 }
  0xfb   :  { %v150_v40 = vpack.c.bf16 %v148_v36, %v146_v35 }
  0xfc   :  { %v151_v41 = vpack.c.bf16 %v149_v39, %v147_v38 }
  0xfe   :  { %319 = vmatprep.mubr.bf16.mxu1 %v151_v41 }
  0xff   :  { %320 = vmatmul.mubr.bf16.vlgmr.msra.gmra.mrb[0].mxu1 %v150_v40 }
 0x100   :  { %659 = vmatprep.mubr.msk.bf16.mxu1 %vm739_vm1, %v738_v27  ;;  %652 = vmatpush3.bf16.msra.mxu1 %v706_v45 }
 0x101   :  { %653 = vmatprep.subr.bf16.mxu1 %v738_v27 }
 0x104   :  { %654 = vmatpush3.bf16.msra.mxu1 %v707_v46 }
 0x105   :  { %655 = vmatprep.subr.bf16.mxu1 %v738_v27 }
 0x108   :  { %656 = vmatpush3.bf16.msra.mxu1 %v708_v59 }
 0x109   :  { %657 = vmatprep.subr.bf16.mxu1 %v738_v27 }
 0x10c   :  { %658 = vmatpush3.bf16.msra.mxu1 %v709_v60 }
 0x1d2   :  { %v611_v47 = vpop.f32.mrb[0].mxu1 }
 0x1d3   :  { %v612_v49 = vpop.f32.mrb[1].mxu1 }
 0x1d4   :  { %v613_v50 = vadd.f32 %v612_v49, %v611_v47  ;;  %v614_v51 = vpop.f32.mrb[2].mxu1 }
 0x1d5   :  { %v615_v52 = vpop.f32.mrb[3].mxu1 }
 0x1d6   :  { %v322_v53 = vadd.f32 %v613_v50, %v554_v48  ;;  %v616_v54 = vadd.f32 %v615_v52, %v614_v51 }
 0x1d8   :  { %v325_v55 = vadd.f32 %v616_v54, %v554_v48  ;;  %v328_v56 = vmax.f32 %v322_v53, 0.0 }
 0x1da   :  { %v329_v57 = vmax.f32 %v325_v55, 0.0 }
 0x1dc   :  { %v330_v58 = vpack.c.bf16 %v329_v57, %v328_v56 }
 0x1de   :  { %648 = vmatmul.mubr.bf16.vlgmr.msra.gmra.mrb[4].mxu0 %v330_v58 }
 0x2b1   :  { %v436_v62 = vpop.f32.mrb[4].mxu0 }
 0x2b2   :  { %v437_v63 = vadd.f32 %v571_v61, %v436_v62  ;;  %v649_v0 = vpop.f32.mrb[5].mxu0 }
 0x2b3   :  { %v439_v1 = vpop.f32.mrb[6].mxu0 }
 0x2b4   :  { %v440_v2 = vadd.f32 %v571_v61, %v439_v1  ;;  %v650_v3 = vpop.f32.mrb[7].mxu0  ;;  %v443_v4 = vmax.f32 %v437_v63, 0.0 }
 0x2b6   :  { %v444_v5 = vmax.f32 %v440_v2, 0.0 }
 0x2b8   :  { %v445_v6 = vpack.c.bf16 %v444_v5, %v443_v4 }
 0x2ba   :  { %660 = vmatmul.mubr.msk.bf16.vlgmr.msra.gmra.mrb[4].mxu1 %vm99_vm0, %v445_v6 }
 0x38d   :  { %v522_v8 = vpop.f32.mrb[4].mxu1 }
 0x38e   :  { %v661_v9 = vpop.f32.mrb[5].mxu1  ;;  %v523_v11 = vadd.f32 %v580_v7, %v522_v8 }
 0x38f   :  { %v525_v10 = vpop.f32.mrb[6].mxu1 }
 0x390   :  { %v526_v12 = vadd.f32 %v580_v7, %v525_v10  ;;  %v662_v13 = vpop.f32.mrb[7].mxu1 }
 0x392   :  { %v593_v14 = vpack.c.bf16 %v526_v12, %v523_v11 }
 0x394   :  { %594 = vst [vmem:[%s906_s8] sm:$0xff] %v593_v14  }
 0x395   :  { %543 = vsyncpa [#allocation3], 1 }

</bundles_post_ra>
